<compile_context>
chip_gen: v6e
topology: v6e:2x2x1
jax: 0.10.0
libtpu: 0.0.40
codegen_flags: <defaults>
</compile_context>

<pallas_src>
import functools
import math

import jax
import jax.numpy as jnp
from jax.experimental import pallas as pl
from jax.experimental.pallas import tpu as pltpu


def _round_up(x, m):
    return ((x + m - 1) // m) * m


def _pick_tb(b):
    """Batch tile: multiple of 8 (f32 sublane tile) so 2-D batch-major blocks
    satisfy the (8,128) rule without padding N/E; prefer >= 2 grid steps so
    DMA/compute overlap and both v7x TensorCores get work; TB up to 32 to
    amortize MXU weight pushes."""
    if b <= 8:
        return 8           # one grid step is unavoidable without wasteful padding
    for tb in (32, 24, 16, 8):
        if b % tb == 0 and b // tb >= 2:
            return tb
    return 8               # falls back to padding the batch to a multiple of 8


def _attention_kernel(enc_ref, h_ref, wkt_ref, bk_ref, wq_ref, bq_ref,
                      wv_ref, bv_ref, out_ref, alpha_ref, *, scale):
    cdt = wq_ref.dtype                     # MXU compute dtype (bf16 or f32)

    # q projection for the whole batch tile: (TB, D) @ (D, A), f32 accumulation.
    q = (jnp.dot(h_ref[...].astype(cdt), wq_ref[...],
                 preferred_element_type=jnp.float32) + bq_ref[...])       # (TB, A) f32

    # Key-projection fold (exact):
    #   score[b,n] = (enc[b,n] @ Wk + bk) . q[b]
    #              = enc[b,n] . (Wk^T q[b]) + bk . q[b]
    wkq = jnp.dot(q.astype(cdt), wkt_ref[...],
                  preferred_element_type=jnp.float32)                     # (TB, E) f32
    bkq = jnp.sum(bk_ref[...] * q, axis=-1, keepdims=True)                # (TB, 1) f32

    enc = enc_ref[...]                                                    # (TB, N, E) f32

    # Scores via VPU multiply + lane reduce (no M=1 MXU matmuls).
    scores = (jnp.sum(enc * wkq[:, None, :], axis=-1) + bkq) * scale      # (TB, N)
    scores = jnp.maximum(scores, 0.0)                                     # relu

    # Softmax over the regions axis; approx reciprocal runs on the EUP slot.
    m = jnp.max(scores, axis=-1, keepdims=True)
    e = jnp.exp(scores - m)
    alpha = e * pl.reciprocal(jnp.sum(e, axis=-1, keepdims=True), approx=True)

    # Value-projection fold (sum_n alpha[b,n] == 1):
    #   att_out[b] = sum_n alpha[b,n] (enc[b,n] @ Wv + bv)
    #              = (sum_n alpha[b,n] enc[b,n]) @ Wv + bv
    ctx = jnp.sum(alpha[:, :, None] * enc, axis=1)                        # (TB, E) f32
    att = (jnp.dot(ctx.astype(cdt), wv_ref[...],
                   preferred_element_type=jnp.float32) + bv_ref[...])     # (TB, E) f32

    out_ref[...] = att.astype(out_ref.dtype)                              # (TB, E)
    alpha_ref[...] = alpha.astype(alpha_ref.dtype)                        # (TB, N)


def attention_forward(encoder_out, h, params, *, compute_dtype=jnp.bfloat16):
    """encoder_out: (B, N, E) f32, h: (B, D) f32 -> (att_out (B, E), alpha (B, N))."""
    wk, bk, wq, bq, wv, bv = (params[n] for n in ("wk", "bk", "wq", "bq", "wv", "bv"))
    B, N, E = encoder_out.shape
    D = h.shape[1]
    A = wk.shape[1]
    scale = 1.0 / math.sqrt(A)

    TB = _pick_tb(B)
    B_pad = _round_up(B, TB)
    if B_pad != B:
        # Only the batch dim is ever padded (zeros -> finite, harmless rows).
        # TODO(synk): for batches that are already multiples of 8 no copy happens;
        # prefer such batch sizes to keep encoder_out strictly zero-copy.
        encoder_out = jnp.pad(encoder_out, ((0, B_pad - B), (0, 0), (0, 0)))
        h = jnp.pad(h, ((0, B_pad - B), (0, 0)))

    # Only the (small) weights are cast to the MXU dtype; activations stay f32
    # and never go through the MXU.  Biases stay f32 (added post-accumulation).
    wkt_c = wk.T.astype(compute_dtype)        # (A, E): Wk^T for the key fold
    wq_c = wq.astype(compute_dtype)           # (D, A)
    wv_c = wv.astype(compute_dtype)           # (E, E)

    # VMEM budget: enc/h tiles double-buffered, weights single-buffered,
    # output slabs double-buffered.  Cap at 40 MiB so it also fits v7x (64 MiB).
    w_item = jnp.dtype(compute_dtype).itemsize
    vmem_needed = (TB * N * E * 4 * 2 +                      # enc tile x2
                   TB * D * 4 * 2 +                          # h tile x2
                   (A * E + D * A + E * E) * w_item +        # weights (Buffered(1))
                   (2 * A + E) * 4 +                         # biases
                   (TB * E + TB * N) * 4 * 2)                # output slabs x2
    vmem_limit = min(max(2 * vmem_needed + (2 << 20), 16 << 20), 40 << 20)

    kernel = functools.partial(_attention_kernel, scale=scale)

    grid_spec = pltpu.PrefetchScalarGridSpec(
        num_scalar_prefetch=0,
        grid=(B_pad // TB,),
        in_specs=[
            pl.BlockSpec((TB, N, E), lambda b: (b, 0, 0)),               # encoder tile (f32)
            pl.BlockSpec((TB, D),    lambda b: (b, 0)),                  # h tile (f32)
            pl.BlockSpec((A, E), lambda b: (0, 0), pipeline_mode=pl.Buffered(1)),  # Wk^T
            pl.BlockSpec((1, A), lambda b: (0, 0), pipeline_mode=pl.Buffered(1)),  # bk
            pl.BlockSpec((D, A), lambda b: (0, 0), pipeline_mode=pl.Buffered(1)),  # Wq
            pl.BlockSpec((1, A), lambda b: (0, 0), pipeline_mode=pl.Buffered(1)),  # bq
            pl.BlockSpec((E, E), lambda b: (0, 0), pipeline_mode=pl.Buffered(1)),  # Wv
            pl.BlockSpec((1, E), lambda b: (0, 0), pipeline_mode=pl.Buffered(1)),  # bv
        ],
        out_specs=(
            pl.BlockSpec((TB, E), lambda b: (b, 0)),                     # att_out slab
            pl.BlockSpec((TB, N), lambda b: (b, 0)),                     # alpha slab
        ),
    )

    att_out_p, alpha_p = pl.pallas_call(
        kernel,
        grid_spec=grid_spec,
        out_shape=(
            jax.ShapeDtypeStruct((B_pad, E), jnp.float32),
            jax.ShapeDtypeStruct((B_pad, N), jnp.float32),
        ),
        compiler_params=pltpu.CompilerParams(
            dimension_semantics=("parallel",),
            vmem_limit_bytes=int(vmem_limit),
        ),
    )(encoder_out, h, wkt_c, bk, wq_c, bq, wv_c, bv)

    return att_out_p[:B], alpha_p[:B]


def attention_reference(encoder_out, h, params):
    """Plain-JAX reference matching the PyTorch forward exactly (f32)."""
    wk, bk, wq, bq, wv, bv = (params[n] for n in ("wk", "bk", "wq", "bq", "wv", "bv"))
    A = wk.shape[1]
    att_k = encoder_out @ wk + bk                                   # (B, N, A)
    att_q = h @ wq + bq                                             # (B, A)
    att_v = encoder_out @ wv + bv                                   # (B, N, E)
    att_final = jnp.einsum("bna,ba->bn", att_k, att_q)[..., None] / math.sqrt(A)
    alpha = jax.nn.softmax(jnp.maximum(att_final, 0.0), axis=1)     # (B, N, 1)
    att_out = jnp.sum(alpha * att_v, axis=1)                        # (B, E)
    return att_out, alpha[..., 0]


def init_params(key, encoder_dim, decoder_dim, att_dim):
    ks = jax.random.split(key, 6)
    s = lambda fan_in: 1.0 / math.sqrt(fan_in)
    return {
        # Stored as (in, out) so the math computes x @ W + b (== PyTorch x @ W.T + b).
        "wk": jax.random.uniform(ks[0], (encoder_dim, att_dim), jnp.float32,
                                 -s(encoder_dim), s(encoder_dim)),
        "bk": jax.random.uniform(ks[1], (1, att_dim), jnp.float32,
                                 -s(encoder_dim), s(encoder_dim)),
        "wq": jax.random.uniform(ks[2], (decoder_dim, att_dim), jnp.float32,
                                 -s(decoder_dim), s(decoder_dim)),
        "bq": jax.random.uniform(ks[3], (1, att_dim), jnp.float32,
                                 -s(decoder_dim), s(decoder_dim)),
        "wv": jax.random.uniform(ks[4], (encoder_dim, encoder_dim), jnp.float32,
                                 -s(encoder_dim), s(encoder_dim)),
        "bv": jax.random.uniform(ks[5], (1, encoder_dim), jnp.float32,
                                 -s(encoder_dim), s(encoder_dim)),
    }


if __name__ == "__main__":
    B, N = 2, 8                 # batch, num encoder regions (seq)
    encoder_dim, decoder_dim, att_dim = 32, 32, 32

    key = jax.random.PRNGKey(0)
    k_enc, k_h, k_p = jax.random.split(key, 3)
    encoder_out = jax.random.normal(k_enc, (B, N, encoder_dim), jnp.float32)
    h = jax.random.normal(k_h, (B, decoder_dim), jnp.float32)
    params = init_params(k_p, encoder_dim, decoder_dim, att_dim)

    ref_out, ref_alpha = attention_reference(encoder_out, h, params)

    # Perf default: bf16 weights on the MXU, f32 activations / accumulation.
    att_bf, alpha_bf = attention_forward(encoder_out, h, params,
                                         compute_dtype=jnp.bfloat16)
    jax.block_until_ready((att_bf, alpha_bf))
    assert att_bf.shape == (B, encoder_dim) and alpha_bf.shape == (B, N)
    assert jnp.allclose(jnp.sum(alpha_bf, axis=-1), 1.0, atol=1e-2)
    assert jnp.allclose(att_bf, ref_out, atol=6e-2, rtol=6e-2)
    assert jnp.allclose(alpha_bf, ref_alpha, atol=6e-2, rtol=6e-2)

    # Full-precision path for a tighter numerical check.
    att_f32, alpha_f32 = attention_forward(encoder_out, h, params,
                                           compute_dtype=jnp.float32)
    jax.block_until_ready((att_f32, alpha_f32))
    assert jnp.allclose(att_f32, ref_out, atol=1e-2, rtol=1e-2)
    assert jnp.allclose(alpha_f32, ref_alpha, atol=1e-2, rtol=1e-2)

    print("KERNEL_OK")
</pallas_src>

<mosaic_0001>
module attributes {stable_mosaic.version = 11 : i64} {
  func.func @_attention_kernel(%arg0: i32, %arg1: memref<8x8x32xf32, #tpu.memory_space<vmem>>, %arg2: memref<8x32xf32, #tpu.memory_space<vmem>>, %arg3: memref<32x32xbf16, #tpu.memory_space<vmem>>, %arg4: memref<1x32xf32, #tpu.memory_space<vmem>>, %arg5: memref<32x32xbf16, #tpu.memory_space<vmem>>, %arg6: memref<1x32xf32, #tpu.memory_space<vmem>>, %arg7: memref<32x32xbf16, #tpu.memory_space<vmem>>, %arg8: memref<1x32xf32, #tpu.memory_space<vmem>>, %arg9: memref<8x32xf32, #tpu.memory_space<vmem>>, %arg10: memref<8x8xf32, #tpu.memory_space<vmem>>) attributes {dimension_semantics = [#tpu.dimension_semantics<parallel>], iteration_bounds = array<i64: 1>, scalar_prefetch = 0 : i64, scratch_operands = 0 : i64, tpu.core_type = #tpu.core_type<tc>, window_params = [{transform_indices = @transform_0, window_bounds = array<i64: 8, 8, 32>}, {transform_indices = @transform_1, window_bounds = array<i64: 8, 32>}, {pipeline_mode = #tpu.pipeline_mode<synchronous>, transform_indices = @transform_2, window_bounds = array<i64: 32, 32>}, {pipeline_mode = #tpu.pipeline_mode<synchronous>, transform_indices = @transform_3, window_bounds = array<i64: 1, 32>}, {pipeline_mode = #tpu.pipeline_mode<synchronous>, transform_indices = @transform_4, window_bounds = array<i64: 32, 32>}, {pipeline_mode = #tpu.pipeline_mode<synchronous>, transform_indices = @transform_5, window_bounds = array<i64: 1, 32>}, {pipeline_mode = #tpu.pipeline_mode<synchronous>, transform_indices = @transform_6, window_bounds = array<i64: 32, 32>}, {pipeline_mode = #tpu.pipeline_mode<synchronous>, transform_indices = @transform_7, window_bounds = array<i64: 1, 32>}, {transform_indices = @transform_8, window_bounds = array<i64: 8, 32>}, {transform_indices = @transform_9, window_bounds = array<i64: 8, 8>}]} {
    %c0 = arith.constant 0 : index
    %c0_0 = arith.constant 0 : index
    %0 = vector.load %arg2[%c0, %c0_0] : memref<8x32xf32, #tpu.memory_space<vmem>>, vector<8x32xf32>
    %1 = arith.truncf %0 : vector<8x32xf32> to vector<8x32xbf16>
    %c0_1 = arith.constant 0 : index
    %c0_2 = arith.constant 0 : index
    %2 = vector.load %arg5[%c0_1, %c0_2] : memref<32x32xbf16, #tpu.memory_space<vmem>>, vector<32x32xbf16>
    %cst = arith.constant dense<0.000000e+00> : vector<8x32xf32>
    %3 = tpu.matmul %1, %2, %cst {dimension_numbers = #tpu.dot_dimension_numbers<[1], [0], [0], [1], [0, 0, 1, 1], [], []>} : vector<8x32xbf16>, vector<32x32xbf16>, vector<8x32xf32> -> vector<8x32xf32>
    %c0_3 = arith.constant 0 : index
    %c0_4 = arith.constant 0 : index
    %4 = vector.load %arg6[%c0_3, %c0_4] : memref<1x32xf32, #tpu.memory_space<vmem>>, vector<1x32xf32>
    %5 = vector.broadcast %4 : vector<1x32xf32> to vector<8x32xf32>
    %6 = arith.addf %3, %5 : vector<8x32xf32>
    %7 = arith.truncf %6 : vector<8x32xf32> to vector<8x32xbf16>
    %c0_5 = arith.constant 0 : index
    %c0_6 = arith.constant 0 : index
    %8 = vector.load %arg3[%c0_5, %c0_6] : memref<32x32xbf16, #tpu.memory_space<vmem>>, vector<32x32xbf16>
    %cst_7 = arith.constant dense<0.000000e+00> : vector<8x32xf32>
    %9 = tpu.matmul %7, %8, %cst_7 {dimension_numbers = #tpu.dot_dimension_numbers<[1], [0], [0], [1], [0, 0, 1, 1], [], []>} : vector<8x32xbf16>, vector<32x32xbf16>, vector<8x32xf32> -> vector<8x32xf32>
    %c0_8 = arith.constant 0 : index
    %c0_9 = arith.constant 0 : index
    %10 = vector.load %arg4[%c0_8, %c0_9] : memref<1x32xf32, #tpu.memory_space<vmem>>, vector<1x32xf32>
    %11 = vector.broadcast %10 : vector<1x32xf32> to vector<8x32xf32>
    %12 = arith.mulf %11, %6 : vector<8x32xf32>
    %cst_10 = arith.constant dense<0.000000e+00> : vector<8xf32>
    %13 = vector.multi_reduction <add>, %12, %cst_10 [1] : vector<8x32xf32> to vector<8xf32>
    %14 = vector.shape_cast %13 : vector<8xf32> to vector<8x1xf32>
    %c0_11 = arith.constant 0 : index
    %c0_12 = arith.constant 0 : index
    %c0_13 = arith.constant 0 : index
    %15 = vector.load %arg1[%c0_11, %c0_12, %c0_13] : memref<8x8x32xf32, #tpu.memory_space<vmem>>, vector<8x8x32xf32>
    %16 = vector.shape_cast %9 : vector<8x32xf32> to vector<8x1x32xf32>
    %17 = vector.broadcast %16 : vector<8x1x32xf32> to vector<8x8x32xf32>
    %18 = arith.mulf %15, %17 : vector<8x8x32xf32>
    %cst_14 = arith.constant dense<0.000000e+00> : vector<8x8xf32>
    %19 = vector.multi_reduction <add>, %18, %cst_14 [2] : vector<8x8x32xf32> to vector<8x8xf32>
    %20 = vector.broadcast %14 : vector<8x1xf32> to vector<8x8xf32>
    %21 = arith.addf %19, %20 : vector<8x8xf32>
    %cst_15 = arith.constant 0.176776692 : f32
    %22 = vector.broadcast %cst_15 : f32 to vector<8x8xf32>
    %23 = arith.mulf %21, %22 : vector<8x8xf32>
    %cst_16 = arith.constant 0.000000e+00 : f32
    %24 = vector.broadcast %cst_16 : f32 to vector<8x8xf32>
    %25 = arith.maximumf %23, %24 : vector<8x8xf32>
    %cst_17 = arith.constant dense<0xFF800000> : vector<8xf32>
    %26 = vector.multi_reduction <maximumf>, %25, %cst_17 [1] : vector<8x8xf32> to vector<8xf32>
    %27 = vector.shape_cast %26 : vector<8xf32> to vector<8x1xf32>
    %28 = vector.broadcast %27 : vector<8x1xf32> to vector<8x8xf32>
    %29 = arith.subf %25, %28 : vector<8x8xf32>
    %30 = math.exp %29 : vector<8x8xf32>
    %cst_18 = arith.constant dense<0.000000e+00> : vector<8xf32>
    %31 = vector.multi_reduction <add>, %30, %cst_18 [1] : vector<8x8xf32> to vector<8xf32>
    %32 = vector.shape_cast %31 : vector<8xf32> to vector<8x1xf32>
    %33 = tpu.reciprocal %32 {approx = true} : vector<8x1xf32> -> vector<8x1xf32>
    %34 = vector.broadcast %33 : vector<8x1xf32> to vector<8x8xf32>
    %35 = arith.mulf %30, %34 : vector<8x8xf32>
    %36 = vector.shape_cast %35 : vector<8x8xf32> to vector<8x8x1xf32>
    %37 = vector.broadcast %36 : vector<8x8x1xf32> to vector<8x8x32xf32>
    %38 = arith.mulf %37, %15 : vector<8x8x32xf32>
    %cst_19 = arith.constant dense<0.000000e+00> : vector<8x32xf32>
    %39 = vector.multi_reduction <add>, %38, %cst_19 [1] : vector<8x8x32xf32> to vector<8x32xf32>
    %40 = arith.truncf %39 : vector<8x32xf32> to vector<8x32xbf16>
    %c0_20 = arith.constant 0 : index
    %c0_21 = arith.constant 0 : index
    %41 = vector.load %arg7[%c0_20, %c0_21] : memref<32x32xbf16, #tpu.memory_space<vmem>>, vector<32x32xbf16>
    %cst_22 = arith.constant dense<0.000000e+00> : vector<8x32xf32>
    %42 = tpu.matmul %40, %41, %cst_22 {dimension_numbers = #tpu.dot_dimension_numbers<[1], [0], [0], [1], [0, 0, 1, 1], [], []>} : vector<8x32xbf16>, vector<32x32xbf16>, vector<8x32xf32> -> vector<8x32xf32>
    %c0_23 = arith.constant 0 : index
    %c0_24 = arith.constant 0 : index
    %43 = vector.load %arg8[%c0_23, %c0_24] : memref<1x32xf32, #tpu.memory_space<vmem>>, vector<1x32xf32>
    %44 = vector.broadcast %43 : vector<1x32xf32> to vector<8x32xf32>
    %45 = arith.addf %42, %44 : vector<8x32xf32>
    %c0_25 = arith.constant 0 : index
    %c0_26 = arith.constant 0 : index
    %46 = vector.load %arg9[%c0_25, %c0_26] : memref<8x32xf32, #tpu.memory_space<vmem>>, vector<8x32xf32>
    tpu.vector_store %arg9[%c0_25, %c0_26], %45 {strides = array<i32>} : memref<8x32xf32, #tpu.memory_space<vmem>>, vector<8x32xf32>,
    %c0_27 = arith.constant 0 : index
    %c0_28 = arith.constant 0 : index
    %47 = vector.load %arg10[%c0_27, %c0_28] : memref<8x8xf32, #tpu.memory_space<vmem>>, vector<8x8xf32>
    tpu.vector_store %arg10[%c0_27, %c0_28], %35 {strides = array<i32>} : memref<8x8xf32, #tpu.memory_space<vmem>>, vector<8x8xf32>,
    return
  }
  func.func @transform_0(%arg0: i32) -> (i32, i32, i32) {
    %c0_i32 = arith.constant 0 : i32
    %c0_i32_0 = arith.constant 0 : i32
    %c0_i32_1 = arith.constant 0 : i32
    return %arg0, %c0_i32, %c0_i32_0 : i32, i32, i32
  }
  func.func @transform_1(%arg0: i32) -> (i32, i32) {
    %c0_i32 = arith.constant 0 : i32
    %c0_i32_0 = arith.constant 0 : i32
    return %arg0, %c0_i32 : i32, i32
  }
  func.func @transform_2(%arg0: i32) -> (i32, i32) {
    %c0_i32 = arith.constant 0 : i32
    %c0_i32_0 = arith.constant 0 : i32
    %c0_i32_1 = arith.constant 0 : i32
    return %c0_i32, %c0_i32_0 : i32, i32
  }
  func.func @transform_3(%arg0: i32) -> (i32, i32) {
    %c0_i32 = arith.constant 0 : i32
    %c0_i32_0 = arith.constant 0 : i32
    %c0_i32_1 = arith.constant 0 : i32
    return %c0_i32, %c0_i32_0 : i32, i32
  }
  func.func @transform_4(%arg0: i32) -> (i32, i32) {
    %c0_i32 = arith.constant 0 : i32
    %c0_i32_0 = arith.constant 0 : i32
    %c0_i32_1 = arith.constant 0 : i32
    return %c0_i32, %c0_i32_0 : i32, i32
  }
  func.func @transform_5(%arg0: i32) -> (i32, i32) {
    %c0_i32 = arith.constant 0 : i32
    %c0_i32_0 = arith.constant 0 : i32
    %c0_i32_1 = arith.constant 0 : i32
    return %c0_i32, %c0_i32_0 : i32, i32
  }
  func.func @transform_6(%arg0: i32) -> (i32, i32) {
    %c0_i32 = arith.constant 0 : i32
    %c0_i32_0 = arith.constant 0 : i32
    %c0_i32_1 = arith.constant 0 : i32
    return %c0_i32, %c0_i32_0 : i32, i32
  }
  func.func @transform_7(%arg0: i32) -> (i32, i32) {
    %c0_i32 = arith.constant 0 : i32
    %c0_i32_0 = arith.constant 0 : i32
    %c0_i32_1 = arith.constant 0 : i32
    return %c0_i32, %c0_i32_0 : i32, i32
  }
  func.func @transform_8(%arg0: i32) -> (i32, i32) {
    %c0_i32 = arith.constant 0 : i32
    %c0_i32_0 = arith.constant 0 : i32
    return %arg0, %c0_i32 : i32, i32
  }
  func.func @transform_9(%arg0: i32) -> (i32, i32) {
    %c0_i32 = arith.constant 0 : i32
    %c0_i32_0 = arith.constant 0 : i32
    return %arg0, %c0_i32 : i32, i32
  }
}

</mosaic_0001>

<bundles_post_ra>
// kernel: tpu_custom_call.1
= control target key start
LH: loop header
LB: loop body
LE: loop exit
PB: predicated region body
PF: predicated region fallthrough
CT: control target
= control target key end

     0   :  { %15 = vsyncpa [#allocation3], 0  ;;  %s1555_s0 = inlined_call_operand.hbm [shape: f32[8,8,32], index: 0, kind: input, shape index: {}]   ;;  %s1556_s1 = inlined_call_operand.hbm [shape: f32[8,32], index: 1, kind: input, shape index: {}]   ;;  %s1557_s2 = inlined_call_operand.hbm [shape: bf16[32,32], index: 2, kind: input, shape index: {}]   ;;  %s1558_s3 = inlined_call_operand.vmem [shape: f32[1,32], index: 3, kind: input, shape index: {}]   ;;  %s1559_s4 = inlined_call_operand.hbm [shape: bf16[32,32], index: 4, kind: input, shape index: {}]   ;;  %s1560_s5 = inlined_call_operand.vmem [shape: f32[1,32], index: 5, kind: input, shape index: {}]   ;;  %s1561_s6 = inlined_call_operand.hbm [shape: bf16[32,32], index: 6, kind: input, shape index: {}]   ;;  %s1562_s7 = inlined_call_operand.vmem [shape: f32[1,32], index: 7, kind: input, shape index: {}]   ;;  %s1563_s8 = inlined_call_operand.hbm [shape: f32[8,32], index: 8, kind: output, shape index: {0}]   ;;  %s1564_s9 = inlined_call_operand.hbm [shape: f32[8,8], index: 9, kind: output, shape index: {1}]  }
   0x1   :  { %16 = vsyncpa [#allocation6], 0 }
   0x2   :  { %17 = vsyncpa [#allocation9], 0 }
   0x3   :  { %18 = vsyncpa [#allocation4], 0 }
   0x4   :  { %19 = vsyncpa [#allocation13], 0  ;;  %s1221_s30 = smov [#allocation5]  }
   0x5   :  { %s38_s10 = sshll.u32 %s1221_s30, 4  ;;  %s39_s10 = int_to_ptr.vmem [resolvable:$true] %s38_s10 }
   0x6   :  { %s1079_s11 = scalar_lea.vmem %s39_s10, 128  ;;  %p1084_p1 = scmp.lt.s32.totalorder %s39_s10, %s39_s10 }
   0x7   :  { %p1080_p0 = scmp.ne.s32.totalorder %s39_s10, %s1079_s11  ;;  %p1085_p2 = scmp.lt.s32.totalorder %s1079_s11, %s1079_s11 }
   0x9   :  { %p1086_p3 = por %p1085_p2, %p1084_p1 }
   0xb   :  { %p1087_p4 = pnand %p1086_p3, %p1080_p0 }
   0xd   :  { %1090 = shalt.err (!%p1087_p4)
}
   0xe   :  { %41 = dma.hbm_to_vmem [thread:$0]  %s1556_s1, 128, %s39_s10, [#allocation6]  }
   0xf   :  { %s1222_s14 = smov [#allocation8]   ;;  %s1223_s16 = smov [#allocation2]  }
  0x10   :  { %s61_s15 = sshll.u32 %s1222_s14, 4  ;;  %s25_s17 = sshll.u32 %s1223_s16, 4  ;;  %s62_s15 = int_to_ptr.vmem [resolvable:$true] %s61_s15  ;;  %s26_s17 = int_to_ptr.vmem [resolvable:$true] %s25_s17 }
  0x11   :  { %s1099_s18 = scalar_lea.vmem %s62_s15, 256  ;;  %p1104_p6 = scmp.lt.s32.totalorder %s62_s15, %s62_s15 }
  0x12   :  { %p1100_p5 = scmp.ne.s32.totalorder %s62_s15, %s1099_s18  ;;  %p1105_p7 = scmp.lt.s32.totalorder %s1099_s18, %s1099_s18 }
  0x14   :  { %p1106_p8 = por %p1105_p7, %p1104_p6 }
  0x16   :  { %p1107_p9 = pnand %p1106_p8, %p1100_p5 }
  0x18   :  { %1110 = shalt.err (!%p1107_p9)
}
  0x19   :  { %s1224_s19 = smov 64   ;;  %s1225_s20 = smov 4  }
  0x1a   :  { %67 = dma.hbm_to_vmem [thread:$0]  %s1559_s4, 256, %s62_s15, [#allocation9], %s1224_s19, %s1224_s19, %s1225_s20  }
  0x1b   :  { %s1119_s1 = scalar_lea.vmem %s26_s17, 1024  ;;  %p1124_p11 = scmp.lt.s32.totalorder %s26_s17, %s26_s17 }
  0x1c   :  { %p1120_p10 = scmp.ne.s32.totalorder %s26_s17, %s1119_s1  ;;  %p1125_p12 = scmp.lt.s32.totalorder %s1119_s1, %s1119_s1 }
  0x1e   :  { %p1126_p13 = por %p1125_p12, %p1124_p11 }
  0x20   :  { %p1127_p0 = pnand %p1126_p13, %p1120_p10 }
  0x22   :  { %1130 = shalt.err (!%p1127_p0)
}
  0x23   :  { %s1226_s23 = smov 128   ;;  %s1227_s24 = smov 8  }
  0x24   :  { %31 = dma.hbm_to_vmem [thread:$0]  %s1555_s0, 1024, %s26_s17, [#allocation3], %s1226_s23, %s1226_s23, %s1227_s24  }
  0x25   :  { %s1228_s27 = smov [#allocation7]   ;;  %s1229_s29 = smov [#allocation10]  }
  0x26   :  { %s47_s28 = sshll.u32 %s1228_s27, 4  ;;  %s75_s30 = sshll.u32 %s1229_s29, 4  ;;  %s48_s28 = int_to_ptr.vmem [resolvable:$true] %s47_s28  ;;  %s76_s30 = int_to_ptr.vmem [resolvable:$true] %s75_s30 }
  0x27   :  { %s1139_s4 = scalar_lea.vmem %s48_s28, 256  ;;  %p1144_p2 = scmp.lt.s32.totalorder %s48_s28, %s48_s28 }
  0x28   :  { %p1140_p1 = scmp.ne.s32.totalorder %s48_s28, %s1139_s4  ;;  %p1145_p3 = scmp.lt.s32.totalorder %s1139_s4, %s1139_s4 }
  0x2a   :  { %p1146_p4 = por %p1145_p3, %p1144_p2 }
  0x2c   :  { %p1147_p5 = pnand %p1146_p4, %p1140_p1 }
  0x2e   :  { %1150 = shalt.err (!%p1147_p5)
}
  0x2f   :  { %53 = dma.hbm_to_vmem [thread:$0]  %s1557_s2, 256, %s48_s28, [#allocation6], %s1224_s19, %s1224_s19, %s1225_s20  }
  0x30   :  { %s1159_s0 = scalar_lea.vmem %s76_s30, 256  ;;  %p1164_p7 = scmp.lt.s32.totalorder %s76_s30, %s76_s30 }
  0x31   :  { %p1160_p6 = scmp.ne.s32.totalorder %s76_s30, %s1159_s0  ;;  %p1165_p8 = scmp.lt.s32.totalorder %s1159_s0, %s1159_s0 }
  0x33   :  { %p1166_p9 = por %p1165_p8, %p1164_p7 }
  0x35   :  { %p1167_p10 = pnand %p1166_p9, %p1160_p6 }
  0x37   :  { %1170 = shalt.err (!%p1167_p10)
}
  0x38   :  { %81 = dma.hbm_to_vmem [thread:$0]  %s1561_s6, 256, %s76_s30, [#allocation9], %s1224_s19, %s1224_s19, %s1225_s20  }
  0x39   :  { %1211 = dma.done.wait [#allocation3], 1024  }
  0x3a   :  { %1212 = vsyncadd [#allocation3], 4294966272 }
  0x3b   :  { %1213 = dma.done.wait [#allocation6], 384  }
  0x3c   :  { %1214 = vsyncadd [#allocation6], 4294966912 }
  0x3d   :  { %1215 = dma.done.wait [#allocation9], 512  }
  0x3e   :  { %1216 = vsyncadd [#allocation9], 4294966784  ;;  %v1230_v0 = vmov 0.0   ;;  %vm1231_vm0 = vmmov 0   ;;  %v1047_v1 = vld [vmem:[#allocation8 + $0x8] sm:$0xff]   ;;  %v1048_v2 = vld [vmem:[#allocation8] sm:$0xff]   ;;  %v253_v17 = vlaneseq }
  0x3f   :  { %1006 = vmatprep.subr.bf16.mxu0 %v1230_v0  ;;  %1010 = vmatprep.mubr.msk.bf16.mxu0 %vm1231_vm0, %v1230_v0  ;;  %v100_v3 = vld [vmem:[#allocation5] sm:$0xff]  ;;  %v1049_v4 = vld [vmem:[#allocation7 + $0x8] sm:$0xff]   ;;  %vm125_vm1 = vcmask 261120   ;;  %v1050_v6 = vld [vmem:[#allocation7] sm:$0xff]   ;;  %v1232_v21 = vmov 1966171168  }
  0x40   :  { %1014 = vmatprep.subr.bf16.mxu1 %v1230_v0  ;;  %1018 = vmatprep.mubr.msk.bf16.mxu1 %vm1231_vm0, %v1230_v0  ;;  %v101_v5 = vpack.c.bf16 %v100_v3, %v100_v3  ;;  %v985_v7 = vld [vmem:[%s1560_s5] ss:$0 sm:$0xff]  ;;  %v1330_v18 = vshrl.u32 %v253_v17, 7  ;;  %v468_v19 = vand.u32 127, %v253_v17  ;;  %v251_v22 = vunpack.c.l.s4 %v1232_v21  ;;  %v1343_v42 = vld [vmem:[#allocation2 + $0x8] sm:$0xff]  ;;  %v1348_v48 = vld [vmem:[#allocation2 + $0x18] sm:$0xff] }
  0x41   :  { %1007 = vmatpush3.bf16.msra.mxu0 %v1047_v1  ;;  %1015 = vmatpush3.bf16.msra.mxu1 %v1049_v4  ;;  %v992_v9 = vld [vmem:[%s1558_s3] ss:$0 sm:$0xff]  ;;  %v1350_v49 = vld [vmem:[#allocation2 + $0x10] sm:$0xff]  ;;  %v1355_v54 = vld [vmem:[#allocation2 + $0x28] sm:$0xff]  ;;  %vm501_vm2 = vcmask 1041409   ;;  %vm503_vm3 = vcmask 1042434  }
  0x42   :  { %1008 = vmatprep.subr.bf16.mxu0 %v1230_v0  ;;  %1016 = vmatprep.subr.bf16.mxu1 %v1230_v0  ;;  %v1333_v20 = vsub.s32 %v468_v19, %v1330_v18  ;;  %v252_v23 = vunpack.c.0.s8 %v251_v22  ;;  %v1337_v32 = vsub.s32 0, %v1330_v18  ;;  %v1339_v34 = vld [vmem:[#allocation2] sm:$0xff]  ;;  %v1366_v1 = vld [vmem:[#allocation2 + $0x38] sm:$0xff]  ;;  %v1385_v21 = vsub.s32 2, %v1330_v18  ;;  %s1234_s3 = smov [#allocation12]  }
  0x43   :  { %v1361_v60 = vld [vmem:[#allocation2 + $0x20] sm:$0xff]  ;;  %vm505_vm4 = vcmask 1043459   ;;  %vm507_vm5 = vcmask 1044484   ;;  %vm509_vm6 = vcmask 1045509   ;;  %vm511_vm7 = vcmask 1046534   ;;  %s970_s5 = sshll.u32 %s1234_s3, 4  ;;  %s971_s5 = int_to_ptr.vmem [resolvable:$true] %s970_s5 }
  0x44   :  { %v255_v24 = vsub.s32 %v252_v23, %v1330_v18  ;;  %vm513_vm8 = vcmask 1047559   ;;  %vm516_vm9 = vcmask 64512   ;;  %s1171_s16 = scalar_lea.vmem %s971_s5, 128  ;;  %p1176_p12 = scmp.lt.s32.totalorder %s971_s5, %s971_s5 }
  0x45   :  { %1009 = vmatpush3.bf16.msra.mxu0 %v1048_v2  ;;  %1017 = vmatpush3.bf16.msra.mxu1 %v1050_v6  ;;  %p1172_p11 = scmp.ne.s32.totalorder %s971_s5, %s1171_s16  ;;  %p1177_p13 = scmp.lt.s32.totalorder %s1171_s16, %s1171_s16 }
  0x46   :  { %1022 = vmatprep.subr.bf16.mxu0 %v1230_v0 }
  0x47   :  { %p1178_p0 = por %p1177_p13, %p1176_p12 }
  0x48   :  { %1011 = vmatmul.mubr.msk.bf16.vlgmr.msra.gmra.mxu0 %vm125_vm1, %v101_v5  ;;  %v1371_v5 = vld [vmem:[#allocation2 + $0x30] sm:$0xff] }
  0x49   :  { %1026 = vmatprep.mubr.msk.bf16.mxu0 %vm1231_vm0, %v1230_v0  ;;  %p1179_p1 = pnand %p1178_p0, %p1172_p11 }
 0x108   :  { %v163_v8 = vpop.f32.mrf.mxu0 }
 0x109   :  { %v164_v10 = vadd.f32 %v985_v7, %v163_v8 }
 0x10a   :  { %v1012_v11 = vpop.f32.mrf.mxu0 }
 0x10b   :  { %v169_v12 = vpack.c.bf16 %v164_v10, %v164_v10  ;;  %v236_v13 = vmul.f32 %v992_v9, %v164_v10 }
 0x10c   :  { %v166_v14 = vpop.f32.mrf.mxu0 }
 0x10d   :  { %1019 = vmatmul.mubr.msk.bf16.vlgmr.msra.gmra.mxu1 %vm125_vm1, %v169_v12  ;;  %v237_v15 = vsel %vm125_vm1, %v236_v13, 0.0  ;;  %v1233_v12 = vmov 0   ;;  %v1380_v14 = vsub.s32 1, %v1330_v18 }
 0x10e   :  { %238 = vadd.xlane.f32.xlu0 %v237_v15  ;;  %v1013_v16 = vpop.f32.mrf.mxu0  ;;  %1045 = vset.pattern.permute.xlu1 %v1233_v12 }
 0x10f   :  { %1046 = vset.pattern.permute.xlu0 %v1233_v12 }
 0x197   :  { %v239_v13 = vpop.xlane.xlu0 %238 }
 0x198   :  { %v374_v15 = vrot.slane %v239_v13, %v1337_v32  ;;  %v378_v19 = vrot.slane %v239_v13, %v1380_v14 }
 0x1cd   :  { %v223_v25 = vpop.f32.mrf.mxu1 }
 0x1ce   :  { %v249_v26 = vcombine.high %v223_v25, %v223_v25  ;;  %v256_v27 = vrot.slane %v223_v25, %v255_v24 }
 0x1cf   :  { %v1020_v28 = vpop.f32.mrf.mxu1 }
 0x1d0   :  { %v263_v29 = vrot.slane %v249_v26, %v255_v24  ;;  %v264_v30 = vcombine.high %v256_v27, %v256_v27  ;;  %v272_v31 = vrot.slane %v256_v27, %v255_v24  ;;  %v1393_v27 = vsub.s32 3, %v1330_v18 }
 0x1d1   :  { %v226_v33 = vpop.f32.mrf.mxu1  ;;  %v382_v28 = vrot.slane %v239_v13, %v1385_v21 }
 0x1d2   :  { %v265_v35 = vcombine.high %v263_v29, %v263_v29  ;;  %v294_v36 = vcombine.high %v272_v31, %v272_v31  ;;  %v301_v37 = vrot.slane %v272_v31, %v1337_v32  ;;  %v286_v39 = vrot.slane %v264_v30, %v255_v24 }
 0x1d3   :  { %v1021_v38 = vpop.f32.mrf.mxu1  ;;  %v279_v40 = vrot.slane %v263_v29, %v255_v24  ;;  %v1397_v29 = vsub.s32 4, %v1330_v18 }
 0x1d4   :  { %v338_v41 = vmul.f32 %v301_v37, %v1339_v34  ;;  %v293_v43 = vrot.slane %v265_v35, %v255_v24  ;;  %v305_v44 = vrot.slane %v286_v39, %v1337_v32  ;;  %v296_v45 = vcombine.high %v286_v39, %v286_v39 }
 0x1d5   :  { %v309_v46 = vrot.slane %v294_v36, %v1337_v32  ;;  %v317_v55 = vrot.slane %v279_v40, %v1337_v32  ;;  %v295_v59 = vcombine.high %v279_v40, %v279_v40  ;;  %v386_v36 = vrot.slane %v239_v13, %v1393_v27 }
 0x1d6   :  { %v346_v47 = vsel %vm125_vm1, %v338_v41, 0.0  ;;  %v339_v50 = vmul.f32 %v305_v44, %v1343_v42  ;;  %v313_v51 = vrot.slane %v296_v45, %v1337_v32  ;;  %v321_v52 = vrot.slane %v293_v43, %v1337_v32 }
 0x1d7   :  { %347 = vadd.xlane.f32.xlu0 %v346_v47  ;;  %v297_v53 = vcombine.high %v293_v43, %v293_v43  ;;  %v340_v58 = vmul.f32 %v309_v46, %v1350_v49  ;;  %v342_v3 = vmul.f32 %v317_v55, %v1361_v60  ;;  %v325_v4 = vrot.slane %v295_v59, %v1337_v32 }
 0x1d8   :  { %v349_v56 = vsel %vm125_vm1, %v339_v50, 0.0  ;;  %v341_v57 = vmul.f32 %v313_v51, %v1348_v48  ;;  %v343_v62 = vmul.f32 %v321_v52, %v1355_v54  ;;  %v1406_v38 = vsub.s32 5, %v1330_v18 }
 0x1d9   :  { %350 = vadd.xlane.f32.xlu1 %v349_v56  ;;  %v329_v63 = vrot.slane %v297_v53, %v1337_v32  ;;  %v352_v2 = vsel %vm125_vm1, %v340_v58, 0.0  ;;  %v358_v8 = vsel %vm125_vm1, %v342_v3, 0.0  ;;  %v344_v9 = vmul.f32 %v325_v4, %v1371_v5 }
 0x1da   :  { %v355_v61 = vsel %vm125_vm1, %v341_v57, 0.0  ;;  %v361_v6 = vsel %vm125_vm1, %v343_v62, 0.0  ;;  %v390_v39 = vrot.slane %v239_v13, %v1397_v29  ;;  %v394_v46 = vrot.slane %v239_v13, %v1406_v38 }
 0x1db   :  { %356 = vadd.xlane.f32.xlu0 %v355_v61  ;;  %v345_v7 = vmul.f32 %v329_v63, %v1366_v1  ;;  %v364_v11 = vsel %vm125_vm1, %v344_v9, 0.0  ;;  %v1418_v50 = vsub.s32 6, %v1330_v18  ;;  %v1424_v56 = vsub.s32 7, %v1330_v18 }
 0x1dd   :  { %353 = vadd.xlane.f32.xlu1 %v352_v2  ;;  %v367_v10 = vsel %vm125_vm1, %v345_v7, 0.0  ;;  %v398_v57 = vrot.slane %v239_v13, %v1418_v50  ;;  %v402_v63 = vrot.slane %v239_v13, %v1424_v56 }
 0x1df   :  { %362 = vadd.xlane.f32.xlu0 %v361_v6 }
 0x1e1   :  { %359 = vadd.xlane.f32.xlu1 %v358_v8 }
 0x1e3   :  { %368 = vadd.xlane.f32.xlu0 %v367_v10 }
 0x1e5   :  { %365 = vadd.xlane.f32.xlu1 %v364_v11 }
 0x260   :  { %v348_v16 = vpop.xlane.xlu0 %347 }
 0x261   :  { %v411_v17 = vadd.f32 %v374_v15, %v348_v16 }
 0x262   :  { %v351_v23 = vpop.xlane.xlu1 %350 }
 0x263   :  { %v1387_v22 = vmul.f32 0.17677669, %v411_v17  ;;  %v412_v24 = vadd.f32 %v378_v19, %v351_v23 }
 0x264   :  { %v357_v30 = vpop.xlane.xlu0 %356 }
 0x265   :  { %v427_v25 = vmax.f32 %v1387_v22, 0.0  ;;  %v1390_v26 = vmul.f32 0.17677669, %v412_v24  ;;  %v414_v41 = vadd.f32 %v386_v36, %v357_v30 }
 0x266   :  { %v354_v31 = vpop.xlane.xlu1 %353 }
 0x267   :  { %444 = vperm.xlu1 %1045, %v427_v25   ;;  %v428_v33 = vmax.f32 %v1390_v26, 0.0  ;;  %v413_v35 = vadd.f32 %v382_v28, %v354_v31  ;;  %v1420_v51 = vmul.f32 0.17677669, %v414_v41 }
 0x268   :  { %v363_v45 = vpop.xlane.xlu0 %362 }
 0x269   :  { %v1403_v37 = vmul.f32 0.17677669, %v413_v35  ;;  %447 = vperm.xlu0 %1046, %v428_v33   ;;  %v416_v52 = vadd.f32 %v394_v46, %v363_v45  ;;  %v430_v58 = vmax.f32 %v1420_v51, 0.0 }
 0x26a   :  { %v360_v40 = vpop.xlane.xlu1 %359 }
 0x26b   :  { %v429_v43 = vmax.f32 %v1403_v37, 0.0  ;;  %v415_v44 = vadd.f32 %v390_v39, %v360_v40  ;;  %v1430_v59 = vmul.f32 0.17677669, %v416_v52 }
 0x26c   :  { %v369_v62 = vpop.xlane.xlu0 %368 }
 0x26d   :  { %v1413_v47 = vmul.f32 0.17677669, %v415_v44  ;;  %450 = vperm.xlu1 %1045, %v429_v43   ;;  %v432_v2 = vmax.f32 %v1430_v59, 0.0  ;;  %v418_v3 = vadd.f32 %v402_v63, %v369_v62 }
 0x26e   :  { %v366_v55 = vpop.xlane.xlu1 %365 }
 0x26f   :  { %v431_v53 = vmax.f32 %v1413_v47, 0.0  ;;  %v417_v61 = vadd.f32 %v398_v57, %v366_v55  ;;  %v1436_v18 = vmul.f32 0.17677669, %v418_v3 }
 0x271   :  { %456 = vperm.xlu1 %1045, %v431_v53   ;;  %v1434_v4 = vmul.f32 0.17677669, %v417_v61  ;;  %v434_v7 = vmax.f32 %v1436_v18, 0.0 }
 0x273   :  { %v433_v6 = vmax.f32 %v1434_v4, 0.0 }
 0x275   :  { %453 = vperm.xlu1 %1045, %v430_v58  }
 0x279   :  { %459 = vperm.xlu1 %1045, %v432_v2  }
 0x27d   :  { %462 = vperm.xlu1 %1045, %v433_v6  }
 0x281   :  { %465 = vperm.xlu1 %1045, %v434_v7  }
 0x2e2   :  { %v445_v8 = vpop.permute.xlu1 %444 }
 0x2e3   :  { %v472_v17 = vrot.slane %v445_v8, %v1333_v20 }
 0x2e4   :  { %v448_v11 = vpop.permute.xlu0 %447 }
 0x2e5   :  { %v476_v13 = vrot.slane %v448_v11, %v1333_v20 }
 0x2e7   :  { %v502_v23 = vsel %vm501_vm2, %v476_v13, %v472_v17 }
 0x2e8   :  { %v451_v9 = vpop.permute.xlu1 %450 }
 0x2e9   :  { %v480_v15 = vrot.slane %v451_v9, %v1333_v20 }
 0x2eb   :  { %v504_v24 = vsel %vm503_vm3, %v480_v15, %v502_v23 }
 0x2ec   :  { %v457_v10 = vpop.permute.xlu1 %456 }
 0x2ed   :  { %v488_v35 = vrot.slane %v457_v10, %v1333_v20 }
 0x2f0   :  { %v454_v12 = vpop.permute.xlu1 %453 }
 0x2f1   :  { %v484_v19 = vrot.slane %v454_v12, %v1333_v20 }
 0x2f3   :  { %v506_v30 = vsel %vm505_vm4, %v484_v19, %v504_v24 }
 0x2f4   :  { %v460_v16 = vpop.permute.xlu1 %459  ;;  %v508_v39 = vsel %vm507_vm5, %v488_v35, %v506_v30 }
 0x2f5   :  { %v492_v31 = vrot.slane %v460_v16, %v1333_v20 }
 0x2f7   :  { %v510_v41 = vsel %vm509_vm6, %v492_v31, %v508_v39 }
 0x2f8   :  { %v463_v28 = vpop.permute.xlu1 %462 }
 0x2f9   :  { %v496_v36 = vrot.slane %v463_v28, %v1333_v20 }
 0x2fb   :  { %v512_v45 = vsel %vm511_vm7, %v496_v36, %v510_v41 }
 0x2fc   :  { %v466_v40 = vpop.permute.xlu1 %465 }
 0x2fd   :  { %v500_v44 = vrot.slane %v466_v40, %v1333_v20 }
 0x2ff   :  { %v514_v46 = vsel %vm513_vm8, %v500_v44, %v512_v45 }
 0x300   :  { %v517_v51 = vsel %vm516_vm9, %v514_v46, -inf }
 0x301   :  { %518 = vmax.xlane.f32.xlu1 %v517_v51 }
 0x38a   :  { %v519_v52 = vpop.xlane.xlu1 %518 }
 0x38b   :  { %v524_v55 = vrot.slane %v519_v52, %v1337_v32  ;;  %v528_v57 = vrot.slane %v519_v52, %v1380_v14  ;;  %v532_v59 = vrot.slane %v519_v52, %v1385_v21  ;;  %v536_v3 = vrot.slane %v519_v52, %v1393_v27 }
 0x38c   :  { %v540_v10 = vrot.slane %v519_v52, %v1397_v29  ;;  %v544_v13 = vrot.slane %v519_v52, %v1406_v38  ;;  %v548_v26 = vrot.slane %v519_v52, %v1418_v50  ;;  %v552_v15 = vrot.slane %v519_v52, %v1424_v56 }
 0x38d   :  { %v561_v61 = vsub.f32 %v427_v25, %v524_v55  ;;  %v562_v62 = vsub.f32 %v428_v33, %v528_v57  ;;  %v563_v8 = vsub.f32 %v429_v43, %v532_v59  ;;  %v564_v11 = vsub.f32 %v430_v58, %v536_v3 }
 0x38e   :  { %v565_v22 = vsub.f32 %v431_v53, %v540_v10  ;;  %v566_v33 = vsub.f32 %v432_v2, %v544_v13  ;;  %v567_v58 = vsub.f32 %v433_v6, %v548_v26  ;;  %v568_v47 = vsub.f32 %v434_v7, %v552_v15 }
 0x38f   :  { %v569_v63 = vmul.f32 1.442695, %v561_v61  ;;  %v571_v9 = vmul.f32 1.442695, %v562_v62  ;;  %v573_v12 = vmul.f32 1.442695, %v563_v8 }
 0x390   :  { %v575_v25 = vmul.f32 1.442695, %v564_v11  ;;  %v577_v37 = vmul.f32 1.442695, %v565_v22  ;;  %v579_v16 = vmul.f32 1.442695, %v566_v33 }
 0x391   :  { %1053 = vpow2.f32 %v569_v63  ;;  %v581_v53 = vmul.f32 1.442695, %v567_v58  ;;  %v583_v2 = vmul.f32 1.442695, %v568_v47 }
 0x392   :  { %1055 = vpow2.f32 %v571_v9 }
 0x393   :  { %1057 = vpow2.f32 %v573_v12 }
 0x394   :  { %1059 = vpow2.f32 %v575_v25 }
 0x395   :  { %1061 = vpow2.f32 %v577_v37 }
 0x396   :  { %1063 = vpow2.f32 %v579_v16 }
 0x397   :  { %1065 = vpow2.f32 %v581_v53 }
 0x398   :  { %1067 = vpow2.f32 %v583_v2 }
 0x39e   :  { %v1054_v43 = vpop.eup %1053 }
 0x39f   :  { %594 = vperm.xlu0 %1046, %v1054_v43   ;;  %v1056_v17 = vpop.eup %1055 }
 0x3a0   :  { %v1058_v19 = vpop.eup %1057 }
 0x3a1   :  { %v1060_v23 = vpop.eup %1059 }
 0x3a2   :  { %v1062_v24 = vpop.eup %1061 }
 0x3a3   :  { %597 = vperm.xlu0 %1046, %v1056_v17   ;;  %v1064_v4 = vpop.eup %1063 }
 0x3a4   :  { %v1066_v6 = vpop.eup %1065 }
 0x3a5   :  { %v1068_v28 = vpop.eup %1067 }
 0x3a7   :  { %600 = vperm.xlu0 %1046, %v1058_v19  }
 0x3ab   :  { %603 = vperm.xlu0 %1046, %v1060_v23  }
 0x3af   :  { %606 = vperm.xlu0 %1046, %v1062_v24  }
 0x3b3   :  { %609 = vperm.xlu0 %1046, %v1064_v4  }
 0x3b7   :  { %612 = vperm.xlu0 %1046, %v1066_v6  }
 0x3bb   :  { %615 = vperm.xlu0 %1046, %v1068_v28  }
 0x41a   :  { %v595_v30 = vpop.permute.xlu0 %594 }
 0x41b   :  { %v620_v41 = vrot.slane %v595_v30, %v1333_v20 }
 0x41e   :  { %v598_v18 = vpop.permute.xlu0 %597 }
 0x41f   :  { %v624_v39 = vrot.slane %v598_v18, %v1333_v20 }
 0x421   :  { %v649_v51 = vsel %vm501_vm2, %v624_v39, %v620_v41 }
 0x422   :  { %v601_v7 = vpop.permute.xlu0 %600 }
 0x423   :  { %v628_v40 = vrot.slane %v601_v7, %v1333_v20 }
 0x425   :  { %v650_v55 = vsel %vm503_vm3, %v628_v40, %v649_v51 }
 0x426   :  { %v604_v31 = vpop.permute.xlu0 %603 }
 0x427   :  { %v632_v44 = vrot.slane %v604_v31, %v1333_v20 }
 0x429   :  { %v651_v59 = vsel %vm505_vm4, %v632_v44, %v650_v55 }
 0x42a   :  { %v607_v35 = vpop.permute.xlu0 %606 }
 0x42b   :  { %v636_v45 = vrot.slane %v607_v35, %v1333_v20 }
 0x42d   :  { %v652_v61 = vsel %vm507_vm5, %v636_v45, %v651_v59 }
 0x42e   :  { %v610_v36 = vpop.permute.xlu0 %609 }
 0x42f   :  { %v640_v52 = vrot.slane %v610_v36, %v1333_v20 }
 0x431   :  { %v653_v63 = vsel %vm509_vm6, %v640_v52, %v652_v61 }
 0x432   :  { %v613_v46 = vpop.permute.xlu0 %612 }
 0x433   :  { %v644_v57 = vrot.slane %v613_v46, %v1333_v20 }
 0x435   :  { %v654_v8 = vsel %vm511_vm7, %v644_v57, %v653_v63 }
 0x436   :  { %v616_v62 = vpop.permute.xlu0 %615 }
 0x437   :  { %v648_v3 = vrot.slane %v616_v62, %v1333_v20 }
 0x439   :  { %v655_v9 = vsel %vm513_vm8, %v648_v3, %v654_v8 }
 0x43a   :  { %v657_v10 = vsel %vm516_vm9, %v655_v9, 0.0 }
 0x43b   :  { %658 = vadd.xlane.f32.xlu1 %v657_v10 }
 0x4c4   :  { %v659_v11 = vpop.xlane.xlu1 %658 }
 0x4c5   :  { %1069 = vrcp.f32 %v659_v11 }
 0x4d2   :  { %v1070_v12 = vpop.eup %1069 }
 0x4d3   :  { %v669_v13 = vrot.slane %v1070_v12, %v1380_v14  ;;  %v665_v22 = vrot.slane %v1070_v12, %v1337_v32  ;;  %v689_v33 = vrot.slane %v1070_v12, %v1418_v50  ;;  %v673_v37 = vrot.slane %v1070_v12, %v1385_v21 }
 0x4d4   :  { %v677_v16 = vrot.slane %v1070_v12, %v1393_v27  ;;  %v681_v53 = vrot.slane %v1070_v12, %v1397_v29  ;;  %v685_v32 = vrot.slane %v1070_v12, %v1406_v38  ;;  %v693_v50 = vrot.slane %v1070_v12, %v1424_v56 }
 0x4d5   :  { %v703_v25 = vmul.f32 %v1056_v17, %v669_v13  ;;  %v702_v26 = vmul.f32 %v1054_v43, %v665_v22  ;;  %v708_v15 = vmul.f32 %v1066_v6, %v689_v33  ;;  %v704_v58 = vmul.f32 %v1058_v19, %v673_v37  ;;  %v1051_v17 = vld [vmem:[#allocation10 + $0x8] sm:$0xff]   ;;  %v1052_v19 = vld [vmem:[#allocation10] sm:$0xff]  }
 0x4d6   :  { %v705_v47 = vmul.f32 %v1060_v23, %v677_v16  ;;  %v706_v14 = vmul.f32 %v1062_v24, %v681_v53  ;;  %v707_v43 = vmul.f32 %v1064_v4, %v685_v32  ;;  %v709_v21 = vmul.f32 %v1068_v28, %v693_v50  ;;  %1023 = vmatpush3.bf16.msra.mxu0 %v1051_v17 }
 0x4d7   :  { %717 = vperm.xlu1 %1045, %v703_v25   ;;  %712 = vperm.xlu0 %1046, %v702_v26  }
 0x4d8   :  { %1024 = vmatprep.subr.bf16.mxu0 %v1230_v0 }
 0x4da   :  { %1025 = vmatpush3.bf16.msra.mxu0 %v1052_v19 }
 0x4db   :  { %742 = vperm.xlu1 %1045, %v708_v15   ;;  %722 = vperm.xlu0 %1046, %v704_v58  }
 0x4df   :  { %727 = vperm.xlu0 %1046, %v705_v47  }
 0x4e3   :  { %732 = vperm.xlu0 %1046, %v706_v14  }
 0x4e7   :  { %737 = vperm.xlu0 %1046, %v707_v43  }
 0x4eb   :  { %747 = vperm.xlu0 %1046, %v709_v21  }
 0x552   :  { %v718_v27 = vpop.permute.xlu1 %717  ;;  %v713_v2 = vpop.permute.xlu0 %712 }
 0x553   :  { %v751_v29 = vmul.f32 %v718_v27, %v1343_v42  ;;  %v750_v23 = vmul.f32 %v713_v2, %v1339_v34  ;;  %v920_v45 = vrot.slane %v718_v27, %v1333_v20 }
 0x555   :  { %v765_v38 = vsel %vm125_vm1, %v751_v29, 0.0  ;;  %v758_v24 = vsel %vm125_vm1, %v750_v23, 0.0 }
 0x556   :  { %v766_v56 = vrot.slane %v765_v38, 4  ;;  %v759_v4 = vrot.slane %v758_v24, 4  ;;  %v743_v6 = vpop.permute.xlu1 %742  ;;  %v723_v28 = vpop.permute.xlu0 %722 }
 0x557   :  { %v756_v30 = vmul.f32 %v743_v6, %v1371_v5  ;;  %v752_v18 = vmul.f32 %v723_v28, %v1350_v49  ;;  %v916_v5 = vrot.slane %v713_v2, %v1333_v20  ;;  %v924_v49 = vrot.slane %v723_v28, %v1333_v20 }
 0x558   :  { %v767_v0 = vadd.f32 %v766_v56, %v765_v38  ;;  %v760_v7 = vadd.f32 %v759_v4, %v758_v24  ;;  %v940_v47 = vrot.slane %v743_v6, %v1333_v20 }
 0x559   :  { %v800_v31 = vsel %vm125_vm1, %v756_v30, 0.0  ;;  %v772_v42 = vsel %vm125_vm1, %v752_v18, 0.0  ;;  %v945_v3 = vsel %vm501_vm2, %v920_v45, %v916_v5 }
 0x55a   :  { %v768_v35 = vrot.slane %v767_v0, 2  ;;  %v761_v34 = vrot.slane %v760_v7, 2  ;;  %v801_v36 = vrot.slane %v800_v31, 4  ;;  %v773_v39 = vrot.slane %v772_v42, 4  ;;  %v728_v40 = vpop.permute.xlu0 %727 }
 0x55b   :  { %v753_v41 = vmul.f32 %v728_v40, %v1348_v48  ;;  %v928_v59 = vrot.slane %v728_v40, %v1333_v20  ;;  %v946_v10 = vsel %vm503_vm3, %v924_v49, %v945_v3 }
 0x55c   :  { %v769_v44 = vadd.f32 %v768_v35, %v767_v0  ;;  %v774_v46 = vadd.f32 %v773_v39, %v772_v42  ;;  %v762_v52 = vadd.f32 %v761_v34, %v760_v7  ;;  %v802_v55 = vadd.f32 %v801_v36, %v800_v31 }
 0x55d   :  { %v779_v51 = vsel %vm125_vm1, %v753_v41, 0.0  ;;  %v947_v26 = vsel %vm505_vm4, %v928_v59, %v946_v10 }
 0x55e   :  { %v775_v57 = vrot.slane %v774_v46, 2  ;;  %v733_v61 = vpop.permute.xlu0 %732  ;;  %v780_v62 = vrot.slane %v779_v51, 4  ;;  %v770_v48 = vrot.slane %v769_v44, 1  ;;  %v763_v13 = vrot.slane %v762_v52, 1 }
 0x55f   :  { %v754_v63 = vmul.f32 %v733_v61, %v1361_v60  ;;  %v932_v9 = vrot.slane %v733_v61, %v1333_v20  ;;  %v803_v22 = vrot.slane %v802_v55, 2 }
 0x560   :  { %v776_v8 = vadd.f32 %v775_v57, %v774_v46  ;;  %v781_v11 = vadd.f32 %v780_v62, %v779_v51  ;;  %v771_v16 = vadd.f32 %v770_v48, %v769_v44  ;;  %v764_v21 = vadd.f32 %v763_v13, %v762_v52 }
 0x561   :  { %v786_v12 = vsel %vm125_vm1, %v754_v63, 0.0  ;;  %v948_v53 = vsel %vm507_vm5, %v932_v9, %v947_v26  ;;  %v804_v17 = vadd.f32 %v803_v22, %v802_v55 }
 0x562   :  { %v777_v25 = vrot.slane %v776_v8, 1  ;;  %v738_v33 = vpop.permute.xlu0 %737  ;;  %v782_v37 = vrot.slane %v781_v11, 2  ;;  %v787_v15 = vrot.slane %v786_v12, 4  ;;  %v815_v18 = vpack.c.bf16 %v771_v16, %v771_v16 }
 0x563   :  { %v755_v60 = vmul.f32 %v738_v33, %v1355_v54  ;;  %v936_v58 = vrot.slane %v738_v33, %v1333_v20  ;;  %v814_v0 = vpack.c.bf16 %v764_v21, %v764_v21  ;;  %v805_v42 = vrot.slane %v804_v17, 1 }
 0x564   :  { %v783_v14 = vadd.f32 %v782_v37, %v781_v11  ;;  %v788_v32 = vadd.f32 %v787_v15, %v786_v12  ;;  %v778_v19 = vadd.f32 %v777_v25, %v776_v8  ;;  %v842_v40 = vunpack.c.l.b16 %v815_v18 }
 0x565   :  { %v793_v43 = vsel %vm125_vm1, %v755_v60, 0.0  ;;  %v949_v50 = vsel %vm509_vm6, %v936_v58, %v948_v53  ;;  %v841_v41 = vunpack.c.l.b16 %v814_v0  ;;  %v806_v5 = vadd.f32 %v805_v42, %v804_v17 }
 0x566   :  { %v794_v27 = vrot.slane %v793_v43, 4  ;;  %v748_v2 = vpop.permute.xlu0 %747  ;;  %v784_v29 = vrot.slane %v783_v14, 1  ;;  %v789_v54 = vrot.slane %v788_v32, 2  ;;  %v950_v56 = vsel %vm511_vm7, %v940_v47, %v949_v50 }
 0x567   :  { %v757_v23 = vmul.f32 %v748_v2, %v1366_v1  ;;  %v944_v38 = vrot.slane %v748_v2, %v1333_v20  ;;  %v816_v35 = vpack.c.bf16 %v778_v19, %v778_v19  ;;  %v849_v59 = vsel %vm501_vm2, %v842_v40, %v841_v41 }
 0x568   :  { %v795_v24 = vadd.f32 %v794_v27, %v793_v43  ;;  %v785_v4 = vadd.f32 %v784_v29, %v783_v14  ;;  %v790_v6 = vadd.f32 %v789_v54, %v788_v32  ;;  %v820_v63 = vpack.c.bf16 %v806_v5, %v806_v5 }
 0x569   :  { %v807_v28 = vsel %vm125_vm1, %v757_v23, 0.0  ;;  %v951_v30 = vsel %vm513_vm8, %v944_v38, %v950_v56  ;;  %v843_v46 = vunpack.c.l.b16 %v816_v35 }
 0x56a   :  { %v796_v7 = vrot.slane %v795_v24, 2  ;;  %v808_v31 = vrot.slane %v807_v28, 4  ;;  %953 = vst.msk [vmem:[#allocation12] sm:$0xff] %vm516_vm9, %v951_v30  ;;  %v791_v1 = vrot.slane %v790_v6, 1  ;;  %v817_v34 = vpack.c.bf16 %v785_v4, %v785_v4 }
 0x56b   :  { %v850_v48 = vsel %vm503_vm3, %v843_v46, %v849_v59  ;;  %v847_v13 = vunpack.c.l.b16 %v820_v63 }
 0x56c   :  { %v797_v20 = vadd.f32 %v796_v7, %v795_v24  ;;  %v809_v36 = vadd.f32 %v808_v31, %v807_v28  ;;  %v792_v39 = vadd.f32 %v791_v1, %v790_v6  ;;  %v844_v51 = vunpack.c.l.b16 %v817_v34 }
 0x56e   :  { %v798_v44 = vrot.slane %v797_v20, 1  ;;  %v810_v45 = vrot.slane %v809_v36, 2  ;;  %v818_v49 = vpack.c.bf16 %v792_v39, %v792_v39  ;;  %v851_v3 = vsel %vm505_vm4, %v844_v51, %v850_v48 }
 0x570   :  { %v799_v52 = vadd.f32 %v798_v44, %v797_v20  ;;  %v811_v55 = vadd.f32 %v810_v45, %v809_v36  ;;  %v845_v57 = vunpack.c.l.b16 %v818_v49 }
 0x572   :  { %v819_v61 = vpack.c.bf16 %v799_v52, %v799_v52  ;;  %v812_v62 = vrot.slane %v811_v55, 1  ;;  %v852_v10 = vsel %vm507_vm5, %v845_v57, %v851_v3 }
 0x574   :  { %v846_v8 = vunpack.c.l.b16 %v819_v61  ;;  %v813_v9 = vadd.f32 %v812_v62, %v811_v55 }
 0x576   :  { %v853_v11 = vsel %vm509_vm6, %v846_v8, %v852_v10  ;;  %v821_v12 = vpack.c.bf16 %v813_v9, %v813_v9 }
 0x577   :  { %v854_v25 = vsel %vm511_vm7, %v847_v13, %v853_v11 }
 0x578   :  { %v848_v22 = vunpack.c.l.b16 %v821_v12 }
 0x57a   :  { %v855_v26 = vsel %vm513_vm8, %v848_v22, %v854_v25 }
 0x57b   :  { %v856_v33 = vpack.c.b16 %v855_v26, %v855_v26 }
 0x57d   :  { %1027 = vmatmul.mubr.msk.bf16.vlgmr.msra.gmra.mxu0 %vm125_vm1, %v856_v33 }
 0x57e   :  { %1182 = shalt.err (!%p1179_p1)
}
 0x57f   :  { %973 = dma.vmem_to_hbm [thread:$0]  %s971_s5, 128, %s1564_s9, [#allocation13]   ;;  %v993_v37 = vld [vmem:[%s1562_s7] ss:$0 sm:$0xff] }
 0x580   :  { %s1235_s21 = smov [#allocation11]  }
 0x581   :  { %s960_s22 = sshll.u32 %s1235_s21, 4  ;;  %s961_s22 = int_to_ptr.vmem [resolvable:$true] %s960_s22 }
 0x582   :  { %s1191_s1 = scalar_lea.vmem %s961_s22, 128  ;;  %p1196_p3 = scmp.lt.s32.totalorder %s961_s22, %s961_s22 }
 0x583   :  { %p1192_p2 = scmp.ne.s32.totalorder %s961_s22, %s1191_s1  ;;  %p1197_p4 = scmp.lt.s32.totalorder %s1191_s1, %s1191_s1 }
 0x585   :  { %p1198_p5 = por %p1197_p4, %p1196_p3 }
 0x587   :  { %p1199_p6 = pnand %p1198_p5, %p1192_p2 }
 0x63d   :  { %v906_v15 = vpop.f32.mrf.mxu0 }
 0x63e   :  { %v907_v60 = vadd.f32 %v993_v37, %v906_v15 }
 0x63f   :  { %v1028_v58 = vpop.f32.mrf.mxu0 }
 0x640   :  { %912 = vst.msk [vmem:[#allocation11] sm:$0xff] %vm125_vm1, %v907_v60 }
 0x641   :  { %v909_v16 = vpop.f32.mrf.mxu0 }
 0x642   :  { %1202 = shalt.err (!%p1199_p6)
}
 0x643   :  { %963 = dma.vmem_to_hbm [thread:$0]  %s961_s22, 128, %s1563_s8, [#allocation4]   ;;  %v1029_v47 = vpop.f32.mrf.mxu0 }
 0x644   :  { %1217 = dma.done.wait [#allocation4], 128  }
 0x645   :  { %1218 = vsyncadd [#allocation4], 4294967168 }
 0x646   :  { %1219 = dma.done.wait [#allocation13], 128  }
 0x647   :  { %1220 = vsyncadd [#allocation13], 4294967168 }
 0x648   :  { %980 = vsyncpa [#allocation3], 1 }
 0x649   :  { %981 = vsyncpa [#allocation6], 1 }
 0x64a   :  { %982 = vsyncpa [#allocation9], 1 }
 0x64b   :  { %983 = vsyncpa [#allocation4], 1 }
 0x64c   :  { %984 = vsyncpa [#allocation13], 1 }

</bundles_post_ra>
